<compile_context>
chip_gen: v7x
topology: tpu7x:2x2x1
jax: 0.10.0
libtpu: 0.0.40
codegen_flags: <defaults>
</compile_context>

<pallas_src>
import functools
import math

import jax
import jax.numpy as jnp
from jax import lax
from jax.experimental import pallas as pl
from jax.experimental.pallas import tpu as pltpu


# ----------------------------------------------------------------------------
# Init-time helpers (pure JAX; equivalent of the nn.Module __init__).
# ----------------------------------------------------------------------------
def _pe_scale(d_model, temp_bug_fix):
    """Per-index exponent scale: div_term = exp(idx * scale), idx = 0, 2, 4, ..."""
    if temp_bug_fix:
        return -math.log(10000.0) / (d_model // 2)
    # NOTE: intentionally reproduces the original buggy precedence:
    # (-log(1e4) / d_model) // 2  (kept for backward compatibility).
    return -math.log(10000.0) / d_model // 2


def make_sine_pe(d_model, shape=(256, 256), temp_bug_fix=True, dtype=jnp.float32):
    """Build the (d_model, H, W) sinusoidal buffer (matches the PyTorch init)."""
    H, W = shape
    ones = jnp.ones((H, W), dtype=jnp.float32)
    y_position = jnp.cumsum(ones, axis=0)[None]          # (1, H, W)
    x_position = jnp.cumsum(ones, axis=1)[None]          # (1, H, W)
    idx = jnp.arange(0, d_model // 2, 2, dtype=jnp.float32)
    div_term = jnp.exp(idx * _pe_scale(d_model, temp_bug_fix))[:, None, None]
    pe = jnp.zeros((d_model, H, W), dtype=jnp.float32)
    pe = pe.at[0::4, :, :].set(jnp.sin(x_position * div_term))
    pe = pe.at[1::4, :, :].set(jnp.cos(x_position * div_term))
    pe = pe.at[2::4, :, :].set(jnp.sin(y_position * div_term))
    pe = pe.at[3::4, :, :].set(jnp.cos(y_position * div_term))
    return pe.astype(dtype)


# ----------------------------------------------------------------------------
# Tiling: lane-dense spatial blocks (always 128-multiples), bounded VMEM.
# ----------------------------------------------------------------------------
def _tiles(N, C, S):
    # Sublane (channel) tile: full C for typical d_model; 256-cap (8-multiple)
    # keeps a block <= 256*2048*4B = 2 MiB f32; 2 streams double-buffered
    # -> ~8 MiB, inside every generation's default scoped VMEM.
    c_blk = C if C <= 256 else 256
    if S < 128:
        s_blk = S                                      # full extent: always legal
    else:
        # Largest 128-multiple <= S, capped at 2048 lanes; Pallas masks the
        # ragged tail block, so non-128-multiple S still pipelines.
        s_blk = min(2048, (S // 128) * 128)
        # v7x megacore: for batch-1 calls that would collapse to one grid step,
        # split S so both TensorCores get work (no effect on v5e/v6e).
        if N == 1 and C <= c_blk and s_blk >= S and S >= 256:
            s_blk = max(128, ((s_blk // 2) // 128) * 128)
    return c_blk, s_blk


# ----------------------------------------------------------------------------
# Kernels.
# ----------------------------------------------------------------------------
def _pe_add_fused_kernel(x_ref, o_ref, *, width, c_blk, s_blk, scale):
    """out = x + pe, with pe generated in-kernel (no pe HBM stream).

    Channel-only math on (c_blk, 1), spatial-only math on (1, s_blk); a single
    sin per element (cos folded in via a +pi/2 per-channel phase).
    """
    c0 = pl.program_id(0) * c_blk
    s0 = pl.program_id(1) * s_blk

    # ---- channel-only strip (c_blk, 1): frequency group + quadrant ----------
    c_i = c0 + lax.broadcasted_iota(jnp.int32, (c_blk, 1), 0)
    grp = (c_i >> 2).astype(jnp.float32)                   # c // 4
    quad = c_i & 3                                          # c % 4
    div_term = jnp.exp(grp * jnp.float32(2.0 * scale))      # exp(idx*scale), idx=2*grp
    phase = jnp.where((quad & 1) == 1,
                      jnp.float32(math.pi / 2.0),           # cos(x) = sin(x + pi/2)
                      jnp.float32(0.0))
    use_y = quad >= 2                                       # quadrants 2,3 -> y position

    # ---- spatial-only strip (1, s_blk): flattened index -> (row, col) -------
    s_f = (s0 + lax.broadcasted_iota(jnp.int32, (1, s_blk), 1)).astype(jnp.float32)
    w_f = jnp.float32(width)
    row = jnp.floor(s_f / w_f)                              # s // W (f32 quotient)
    col = s_f - row * w_f                                   # s %  W
    # Exact correction of the rounded f32 quotient at integer boundaries
    # (cheap: strip-shaped), correct for arbitrarily large flattened extents.
    over = col >= w_f
    row = jnp.where(over, row + 1.0, row)
    col = jnp.where(over, col - w_f, col)
    under = col < 0.0
    row = jnp.where(under, row - 1.0, row)
    col = jnp.where(under, col + w_f, col)
    x_pos = col + 1.0                                       # cumsum(ones, axis=1)
    y_pos = row + 1.0                                       # cumsum(ones, axis=0)

    # ---- full-tile work: 1 select, 1 mul, 1 add, 1 sin, 1 add ---------------
    pos = jnp.where(use_y, y_pos, x_pos)                    # (c_blk, s_blk)
    pe = jnp.sin(pos * div_term + phase)                    # (c_blk, s_blk) f32

    if o_ref.dtype == jnp.float32:
        o_ref[...] = x_ref[...] + pe
    elif jnp.issubdtype(o_ref.dtype, jnp.floating):
        # bf16/f16-native add (v6e/v7x bf16 VALUs): skip f32 round-trips on x.
        o_ref[...] = x_ref[...] + pe.astype(o_ref.dtype)
    else:
        o_ref[...] = (x_ref[...].astype(jnp.float32) + pe).astype(o_ref.dtype)


def _pe_add_table_kernel(x_ref, pe_ref, o_ref):
    """Last-resort fallback: plain add against a streamed pe table block."""
    if o_ref.dtype == pe_ref.dtype:
        o_ref[...] = x_ref[...] + pe_ref[...]
    else:
        o_ref[...] = (x_ref[...].astype(jnp.float32)
                      + pe_ref[...].astype(jnp.float32)).astype(o_ref.dtype)


# ----------------------------------------------------------------------------
# Wrappers.
# ----------------------------------------------------------------------------
@functools.partial(jax.jit, static_argnames=("temp_bug_fix",))
def position_encoding_sine(x, temp_bug_fix=True):
    """out = x + PE(:H, :W); PE generated inside the kernel.  x: [N, C, H, W]."""
    N, C, H, W = x.shape
    S = H * W
    x3 = x.reshape(N, C, S)                                 # free (bitcast) reshape
    c_blk, s_blk = _tiles(N, C, S)
    grid = (pl.cdiv(C, c_blk), pl.cdiv(S, s_blk), N)

    kernel = functools.partial(_pe_add_fused_kernel, width=W, c_blk=c_blk,
                               s_blk=s_blk, scale=_pe_scale(C, temp_bug_fix))

    elems = N * C * S
    cost = pl.CostEstimate(flops=6 * elems,
                           transcendentals=elems,           # 1 sin / element
                           bytes_accessed=2 * elems * x.dtype.itemsize)

    out3 = pl.pallas_call(
        kernel,
        out_shape=jax.ShapeDtypeStruct((N, C, S), x.dtype),
        grid=grid,
        in_specs=[pl.BlockSpec((None, c_blk, s_blk), lambda c, s, n: (n, c, s))],
        out_specs=pl.BlockSpec((None, c_blk, s_blk), lambda c, s, n: (n, c, s)),
        compiler_params=pltpu.CompilerParams(
            dimension_semantics=("parallel", "parallel", "parallel")),
        cost_estimate=cost,
    )(x3)
    return out3.reshape(N, C, H, W)


@jax.jit
def position_encoding_sine_table(x, pe_flat):
    """LAST-RESORT fallback (adds a 3rd HBM stream: +50% traffic vs fused).
    pe_flat: [C, H*W] built once at init in x.dtype.  N is the innermost grid
    axis so each pe block stays VMEM-resident across the batch."""
    N, C, H, W = x.shape
    S = H * W
    x3 = x.reshape(N, C, S)
    c_blk, s_blk = _tiles(N, C, S)
    grid = (pl.cdiv(C, c_blk), pl.cdiv(S, s_blk), N)

    elems = N * C * S
    cost = pl.CostEstimate(
        flops=elems, transcendentals=0,
        bytes_accessed=2 * elems * x.dtype.itemsize + C * S * pe_flat.dtype.itemsize)

    out3 = pl.pallas_call(
        _pe_add_table_kernel,
        out_shape=jax.ShapeDtypeStruct((N, C, S), x.dtype),
        grid=grid,
        in_specs=[
            pl.BlockSpec((None, c_blk, s_blk), lambda c, s, n: (n, c, s)),
            pl.BlockSpec((c_blk, s_blk), lambda c, s, n: (c, s)),
        ],
        out_specs=pl.BlockSpec((None, c_blk, s_blk), lambda c, s, n: (n, c, s)),
        compiler_params=pltpu.CompilerParams(
            dimension_semantics=("parallel", "parallel", "parallel")),
        cost_estimate=cost,
    )(x3, pe_flat)
    return out3.reshape(N, C, H, W)


if __name__ == "__main__":
    # Small shapes consistent with the module: N=2, d_model=C=8, 16x16 featmap.
    N, C, H, W = 2, 8, 16, 16
    key = jax.random.PRNGKey(0)
    x = jax.random.normal(key, (N, C, H, W), dtype=jnp.float32)

    # Pure-JAX reference (and the fallback table) for the forward semantics.
    pe = make_sine_pe(C, (H, W), temp_bug_fix=True, dtype=x.dtype)   # (C, H, W)
    ref = x + pe[None]

    out = None
    try:
        cand = jax.block_until_ready(position_encoding_sine(x, temp_bug_fix=True))
        if (cand.shape == ref.shape and cand.dtype == x.dtype
                and bool(jnp.allclose(cand, ref, atol=1e-4, rtol=1e-4))):
            out = cand
    except Exception:
        out = None
    if out is None:
        # TODO(synk): last-resort path only — used if in-kernel vector sin/exp
        # do not lower in this Pallas build; streams the precomputed lane-dense
        # (C, H*W) pe table (extra HBM read).
        out = jax.block_until_ready(
            position_encoding_sine_table(x, pe.reshape(C, H * W)))

    assert out.shape == (N, C, H, W)
    assert out.dtype == x.dtype
    assert jnp.allclose(out, ref, atol=1e-4, rtol=1e-4), "mismatch vs reference"
    print("KERNEL_OK")
</pallas_src>

<mosaic_0001>
module attributes {stable_mosaic.version = 11 : i64} {
  func.func @_pe_add_fused_kernel(%arg0: i32, %arg1: i32, %arg2: i32, %arg3: memref<1x8x256xf32, #tpu.memory_space<vmem>>, %arg4: memref<1x8x256xf32, #tpu.memory_space<vmem>>) attributes {dimension_semantics = [#tpu.dimension_semantics<parallel>, #tpu.dimension_semantics<parallel>, #tpu.dimension_semantics<parallel>], iteration_bounds = array<i64: 1, 1, 2>, scalar_prefetch = 0 : i64, scratch_operands = 0 : i64, tpu.core_type = #tpu.core_type<tc>, window_params = [{transform_indices = @transform_0, window_bounds = array<i64: 1, 8, 256>}, {transform_indices = @transform_1, window_bounds = array<i64: 1, 8, 256>}]} {
    %c8_i32 = arith.constant 8 : i32
    %0 = arith.muli %arg0, %c8_i32 : i32
    %c256_i32 = arith.constant 256 : i32
    %1 = arith.muli %arg1, %c256_i32 : i32
    %2 = tpu.iota {dimensions = array<i32: 0>} : vector<8x1xi32>
    %3 = vector.broadcast %0 : i32 to vector<8x1xi32>
    %4 = arith.addi %3, %2 : vector<8x1xi32>
    %c2_i32 = arith.constant 2 : i32
    %5 = vector.broadcast %c2_i32 : i32 to vector<8x1xi32>
    %6 = arith.shrsi %4, %5 : vector<8x1xi32>
    %7 = arith.sitofp %6 : vector<8x1xi32> to vector<8x1xf32>
    %c3_i32 = arith.constant 3 : i32
    %8 = vector.broadcast %c3_i32 : i32 to vector<8x1xi32>
    %9 = arith.andi %4, %8 : vector<8x1xi32>
    %cst = arith.constant -4.60517025 : f32
    %10 = vector.broadcast %cst : f32 to vector<8x1xf32>
    %11 = arith.mulf %7, %10 : vector<8x1xf32>
    %12 = math.exp %11 : vector<8x1xf32>
    %c1_i32 = arith.constant 1 : i32
    %13 = vector.broadcast %c1_i32 : i32 to vector<8x1xi32>
    %14 = arith.andi %9, %13 : vector<8x1xi32>
    %c1_i32_0 = arith.constant 1 : i32
    %15 = vector.broadcast %c1_i32_0 : i32 to vector<8x1xi32>
    %16 = arith.cmpi eq, %14, %15 : vector<8x1xi32>
    %cst_1 = arith.constant 1.57079637 : f32
    %cst_2 = arith.constant 0.000000e+00 : f32
    %17 = vector.broadcast %cst_1 : f32 to vector<8x1xf32>
    %18 = vector.broadcast %cst_2 : f32 to vector<8x1xf32>
    %19 = arith.select %16, %17, %18 : vector<8x1xi1>, vector<8x1xf32>
    %c2_i32_3 = arith.constant 2 : i32
    %20 = vector.broadcast %c2_i32_3 : i32 to vector<8x1xi32>
    %21 = arith.cmpi sge, %9, %20 : vector<8x1xi32>
    %22 = tpu.iota {dimensions = array<i32: 1>} : vector<1x256xi32>
    %23 = vector.broadcast %1 : i32 to vector<1x256xi32>
    %24 = arith.addi %23, %22 : vector<1x256xi32>
    %25 = arith.sitofp %24 : vector<1x256xi32> to vector<1x256xf32>
    %cst_4 = arith.constant 1.600000e+01 : f32
    %26 = vector.broadcast %cst_4 : f32 to vector<1x256xf32>
    %27 = arith.divf %25, %26 : vector<1x256xf32>
    %28 = math.floor %27 : vector<1x256xf32>
    %cst_5 = arith.constant 1.600000e+01 : f32
    %29 = vector.broadcast %cst_5 : f32 to vector<1x256xf32>
    %30 = arith.mulf %28, %29 : vector<1x256xf32>
    %31 = arith.subf %25, %30 : vector<1x256xf32>
    %cst_6 = arith.constant 1.600000e+01 : f32
    %32 = vector.broadcast %cst_6 : f32 to vector<1x256xf32>
    %33 = arith.cmpf oge, %31, %32 : vector<1x256xf32>
    %cst_7 = arith.constant 1.000000e+00 : f32
    %34 = vector.broadcast %cst_7 : f32 to vector<1x256xf32>
    %35 = arith.addf %28, %34 : vector<1x256xf32>
    %36 = arith.select %33, %35, %28 : vector<1x256xi1>, vector<1x256xf32>
    %cst_8 = arith.constant 1.600000e+01 : f32
    %37 = vector.broadcast %cst_8 : f32 to vector<1x256xf32>
    %38 = arith.subf %31, %37 : vector<1x256xf32>
    %39 = arith.select %33, %38, %31 : vector<1x256xi1>, vector<1x256xf32>
    %cst_9 = arith.constant 0.000000e+00 : f32
    %40 = vector.broadcast %cst_9 : f32 to vector<1x256xf32>
    %41 = arith.cmpf olt, %39, %40 : vector<1x256xf32>
    %cst_10 = arith.constant 1.000000e+00 : f32
    %42 = vector.broadcast %cst_10 : f32 to vector<1x256xf32>
    %43 = arith.subf %36, %42 : vector<1x256xf32>
    %44 = arith.select %41, %43, %36 : vector<1x256xi1>, vector<1x256xf32>
    %cst_11 = arith.constant 1.600000e+01 : f32
    %45 = vector.broadcast %cst_11 : f32 to vector<1x256xf32>
    %46 = arith.addf %39, %45 : vector<1x256xf32>
    %47 = arith.select %41, %46, %39 : vector<1x256xi1>, vector<1x256xf32>
    %cst_12 = arith.constant 1.000000e+00 : f32
    %48 = vector.broadcast %cst_12 : f32 to vector<1x256xf32>
    %49 = arith.addf %47, %48 : vector<1x256xf32>
    %cst_13 = arith.constant 1.000000e+00 : f32
    %50 = vector.broadcast %cst_13 : f32 to vector<1x256xf32>
    %51 = arith.addf %44, %50 : vector<1x256xf32>
    %52 = vector.shape_cast %21 : vector<8x1xi1> to vector<8x1xi1>
    %53 = vector.broadcast %52 : vector<8x1xi1> to vector<8x256xi1>
    %54 = vector.shape_cast %51 : vector<1x256xf32> to vector<1x256xf32>
    %55 = vector.broadcast %54 : vector<1x256xf32> to vector<8x256xf32>
    %56 = vector.shape_cast %49 : vector<1x256xf32> to vector<1x256xf32>
    %57 = vector.broadcast %56 : vector<1x256xf32> to vector<8x256xf32>
    %58 = arith.select %53, %55, %57 : vector<8x256xi1>, vector<8x256xf32>
    %59 = vector.broadcast %12 : vector<8x1xf32> to vector<8x256xf32>
    %60 = arith.mulf %58, %59 : vector<8x256xf32>
    %61 = vector.broadcast %19 : vector<8x1xf32> to vector<8x256xf32>
    %62 = arith.addf %60, %61 : vector<8x256xf32>
    %63 = math.sin %62 : vector<8x256xf32>
    %c0 = arith.constant 0 : index
    %c0_14 = arith.constant 0 : index
    %c0_15 = arith.constant 0 : index
    %64 = vector.load %arg3[%c0, %c0_14, %c0_15] : memref<1x8x256xf32, #tpu.memory_space<vmem>>, vector<1x8x256xf32>
    %65 = vector.shape_cast %64 : vector<1x8x256xf32> to vector<8x256xf32>
    %66 = arith.addf %65, %63 : vector<8x256xf32>
    %c0_16 = arith.constant 0 : index
    %c0_17 = arith.constant 0 : index
    %c0_18 = arith.constant 0 : index
    %67 = vector.load %arg4[%c0_16, %c0_17, %c0_18] : memref<1x8x256xf32, #tpu.memory_space<vmem>>, vector<1x8x256xf32>
    %68 = vector.shape_cast %67 : vector<1x8x256xf32> to vector<8x256xf32>
    %69 = vector.shape_cast %66 : vector<8x256xf32> to vector<1x8x256xf32>
    tpu.vector_store %arg4[%c0_16, %c0_17, %c0_18], %69 {strides = array<i32>} : memref<1x8x256xf32, #tpu.memory_space<vmem>>, vector<1x8x256xf32>,
    return
  }
  func.func @transform_0(%arg0: i32, %arg1: i32, %arg2: i32) -> (i32, i32, i32) {
    %c0_i32 = arith.constant 0 : i32
    return %arg2, %arg0, %arg1 : i32, i32, i32
  }
  func.func @transform_1(%arg0: i32, %arg1: i32, %arg2: i32) -> (i32, i32, i32) {
    %c0_i32 = arith.constant 0 : i32
    return %arg2, %arg0, %arg1 : i32, i32, i32
  }
}

module attributes {stable_mosaic.version = 11 : i64} {
  func.func @_pe_add_table_kernel(%arg0: i32, %arg1: i32, %arg2: i32, %arg3: memref<1x8x256xf32, #tpu.memory_space<vmem>>, %arg4: memref<8x256xf32, #tpu.memory_space<vmem>>, %arg5: memref<1x8x256xf32, #tpu.memory_space<vmem>>) attributes {dimension_semantics = [#tpu.dimension_semantics<parallel>, #tpu.dimension_semantics<parallel>, #tpu.dimension_semantics<parallel>], iteration_bounds = array<i64: 1, 1, 2>, scalar_prefetch = 0 : i64, scratch_operands = 0 : i64, tpu.core_type = #tpu.core_type<tc>, window_params = [{transform_indices = @transform_0, window_bounds = array<i64: 1, 8, 256>}, {transform_indices = @transform_1, window_bounds = array<i64: 8, 256>}, {transform_indices = @transform_2, window_bounds = array<i64: 1, 8, 256>}]} {
    %c0 = arith.constant 0 : index
    %c0_0 = arith.constant 0 : index
    %c0_1 = arith.constant 0 : index
    %0 = vector.load %arg3[%c0, %c0_0, %c0_1] : memref<1x8x256xf32, #tpu.memory_space<vmem>>, vector<1x8x256xf32>
    %1 = vector.shape_cast %0 : vector<1x8x256xf32> to vector<8x256xf32>
    %c0_2 = arith.constant 0 : index
    %c0_3 = arith.constant 0 : index
    %2 = vector.load %arg4[%c0_2, %c0_3] : memref<8x256xf32, #tpu.memory_space<vmem>>, vector<8x256xf32>
    %3 = arith.addf %1, %2 : vector<8x256xf32>
    %c0_4 = arith.constant 0 : index
    %c0_5 = arith.constant 0 : index
    %c0_6 = arith.constant 0 : index
    %4 = vector.load %arg5[%c0_4, %c0_5, %c0_6] : memref<1x8x256xf32, #tpu.memory_space<vmem>>, vector<1x8x256xf32>
    %5 = vector.shape_cast %4 : vector<1x8x256xf32> to vector<8x256xf32>
    %6 = vector.shape_cast %3 : vector<8x256xf32> to vector<1x8x256xf32>
    tpu.vector_store %arg5[%c0_4, %c0_5, %c0_6], %6 {strides = array<i32>} : memref<1x8x256xf32, #tpu.memory_space<vmem>>, vector<1x8x256xf32>,
    return
  }
  func.func @transform_0(%arg0: i32, %arg1: i32, %arg2: i32) -> (i32, i32, i32) {
    %c0_i32 = arith.constant 0 : i32
    return %arg2, %arg0, %arg1 : i32, i32, i32
  }
  func.func @transform_1(%arg0: i32, %arg1: i32, %arg2: i32) -> (i32, i32) {
    %c0_i32 = arith.constant 0 : i32
    return %arg0, %arg1 : i32, i32
  }
  func.func @transform_2(%arg0: i32, %arg1: i32, %arg2: i32) -> (i32, i32, i32) {
    %c0_i32 = arith.constant 0 : i32
    return %arg2, %arg0, %arg1 : i32, i32, i32
  }
}

</mosaic_0001>

<bundles_post_ra>
// kernel: position_encoding_sine.1
= control target key start
LH: loop header
LB: loop body
LE: loop exit
PB: predicated region body
PF: predicated region fallthrough
CT: control target
= control target key end

     0   :  { %s693_s6 = smov 0   ;;  %s695_s7 = smov 0   ;;  %s816_s0 = inlined_call_operand.vmem [shape: f32[2,8,256], index: 0, kind: input, shape index: {}]   ;;  %s817_s1 = inlined_call_operand.vmem [shape: f32[2,8,256], index: 1, kind: output, shape index: {}]  }
   0x1   :  { %s697_s8 = smov 0  }
   0x2 LB: > { %s23_s9 = sadd.s32 1, %s670_s7  ;;  %p582_p0 = scmp.ge.s32.totalorder %s674_s8, 1  ;;  %s674_s8 = sphi %s697_s8, %s11_s8   ;;  %s670_s7 = sphi %s695_s7, %s823_s7   ;;  %s666_s6 = sphi %s693_s6, %s822_s6  }
   0x3   : > { %p24_p1 = scmp.ge.s32.totalorder %s23_s9, 2  ;;  %p123_p2 = scmp.lt.s32.totalorder %s674_s8, 3 }
   0x5   : > { %s825_s9 = smov (%p24_p1, %s23_s9), 0  ;;  %p124_p3 = pnand %p582_p0, %p123_p2 }
   0x6   : > { %v189_v0 = vlaneseq (!%p124_p3)  ;;  %v676_v42 = vmov (!%p124_p3), 0.0   ;;  %p160_p4 = scmp.lt.s32.totalorder (!%p124_p3), %s666_s6, 1 }
   0x7   : > { %127 = sbr.rel (%p124_p3) target bundleno = 126 (0x7e), region = 24 }
   0x8   : > { %v190_v1 = vshrl.u32 (!%p124_p3), %v189_v0, 7  ;;  %v204_v2 = vand.u32 (!%p124_p3), 127, %v189_v0 }
   0xa   : > { %v193_v3 = vshra.s32 (!%p124_p3), %v190_v1, 2  ;;  %v205_v4 = vadd.s32 (!%p124_p3), 128, %v204_v2  ;;  %v209_v5 = vcvt.s32.f32 (!%p124_p3), %v204_v2  ;;  %v195_v15 = vand.u32 (!%p124_p3), 3, %v190_v1 }
   0xc   : > { %v194_v6 = vcvt.s32.f32 (!%p124_p3), %v193_v3  ;;  %v210_v7 = vcvt.s32.f32 (!%p124_p3), %v205_v4  ;;  %v212_v8 = vmul.f32 (!%p124_p3), 0.0625, %v209_v5  ;;  %v199_v22 = vand.u32 (!%p124_p3), 1, %v195_v15 }
   0xd   : > { %vm713_vm3 = vcmp.ge.s32.totalorder (!%p124_p3), %v195_v15, 2 }
   0xe   : > { %v196_v9 = vmul.f32 -4.6051702, %v194_v6  ;;  %v213_v10 = vmul.f32 0.0625, %v210_v7  ;;  %v214_v11 = vfloor.f32 %v212_v8  ;;  %vm200_vm5 = vcmp.eq.s32.totalorder %v199_v22, 1  ;;  %s827_s6 = smov (!%p160_p4, %s666_s6), 1 }
   0xf   : > { %v201_v43 = vsel %vm200_vm5, 1.5707964, %v676_v42  ;;  %v677_v8 = vmov 683565275   ;;  %s601_s10 = sshll.u32 %s827_s6, 4 }
  0x10   : > { %v197_v12 = vmul.f32 1.442695, %v196_v9  ;;  %v215_v13 = vfloor.f32 %v213_v10  ;;  %v216_v14 = vmul.f32 16.0, %v214_v11  ;;  %v222_v17 = vadd.f32 1.0, %v214_v11  ;;  %s171_s13 = scalar_lea.vmem %s816_s0, %s601_s10  ;;  %s185_s16 = scalar_lea.vmem %s817_s1, %s601_s10 }
  0x11   : > { %v678_v10 = vmov 2475754826  }
  0x12   : > { %642 = vpow2.f32 %v197_v12  ;;  %v217_v16 = vmul.f32 16.0, %v215_v13  ;;  %v218_v18 = vsub.f32 %v209_v5, %v216_v14  ;;  %v223_v19 = vadd.f32 1.0, %v215_v13 }
  0x13   : > { %v679_v12 = vmov 2131351028   ;;  %v680_v14 = vmov 2102212464  }
  0x14   : > { %v219_v20 = vsub.f32 %v210_v7, %v217_v16  ;;  %vm220_vm0 = vcmp.ge.f32.partialorder %v218_v18, 16.0  ;;  %v587_v21 = vadd.f32 -16.0, %v218_v18  ;;  %v681_v16 = vmov 920167782  }
  0x15   : > { %v224_v23 = vsel %vm220_vm0, %v222_v17, %v214_v11 }
  0x16   : > { %vm221_vm1 = vcmp.ge.f32.partialorder %v219_v20, 16.0  ;;  %v588_v24 = vadd.f32 -16.0, %v219_v20  ;;  %v228_v26 = vsel %vm220_vm0, %v587_v21, %v218_v18  ;;  %v589_v27 = vadd.f32 -1.0, %v224_v23 }
  0x17   : > { %v225_v25 = vsel %vm221_vm1, %v223_v19, %v215_v13  ;;  %vm230_vm2 = vcmp.lt.f32.partialorder %v228_v26, 0.0  ;;  %v236_v30 = vadd.f32 16.0, %v228_v26 }
  0x18   : > { %v229_v28 = vsel %vm221_vm1, %v588_v24, %v219_v20  ;;  %v590_v29 = vadd.f32 -1.0, %v225_v25  ;;  %v234_v32 = vsel %vm230_vm2, %v589_v27, %v224_v23  ;;  %v682_v24 = vmov 1326507024  }
  0x19   : > { %vm231_vm4 = vcmp.lt.f32.partialorder %v229_v28, 0.0  ;;  %v237_v33 = vadd.f32 16.0, %v229_v28  ;;  %v238_v35 = vsel %vm230_vm2, %v236_v30, %v228_v26  ;;  %v242_v36 = vadd.f32 1.0, %v234_v32 }
  0x1a   : > { %v235_v34 = vsel %vm231_vm4, %v590_v29, %v225_v25  ;;  %v240_v38 = vadd.f32 1.0, %v238_v35 }
  0x1b   : > { %v239_v37 = vsel %vm231_vm4, %v237_v33, %v229_v28  ;;  %v243_v39 = vadd.f32 1.0, %v235_v34 }
  0x1c   : > { %v643_v40 = vpop.eup %642  ;;  %v241_v41 = vadd.f32 1.0, %v239_v37  ;;  %v246_v44 = vsel %vm713_vm3, %v242_v36, %v240_v38 }
  0x1d   : > { %v248_v46 = vmul.f32 %v643_v40, %v246_v44 }
  0x1e   : > { %v247_v45 = vsel %vm713_vm3, %v243_v39, %v241_v41 }
  0x1f   : > { %v249_v47 = vmul.f32 %v643_v40, %v247_v45  ;;  %v721_v48 = vadd.f32 %v248_v46, %v201_v43 }
  0x21   : > { %v723_v49 = vadd.f32 %v249_v47, %v201_v43  ;;  %v252_v50 = vand.u32 2147483647, %v721_v48  ;;  %v255_v51 = vand.u32 2139095040, %v721_v48  ;;  %vm254_vm4 = vcmp.lt.s32.totalorder %v721_v48, 0 }
  0x23   : > { %v356_v52 = vand.u32 2147483647, %v723_v49  ;;  %v359_v53 = vand.u32 2139095040, %v723_v49  ;;  %v256_v54 = vshrl.u32 %v255_v51, 23  ;;  %v259_v55 = vand.u32 8388607, %v252_v50 }
  0x24   : > { %vm253_vm5 = vcmp.le.f32.partialorder %v252_v50, 0.7853982 }
  0x25   : > { %v360_v56 = vshrl.u32 %v359_v53, 23  ;;  %v363_v57 = vand.u32 8388607, %v356_v52  ;;  %v591_v58 = vadd.s32 4294967169, %v256_v54  ;;  %v260_v61 = vor.u32 8388608, %v259_v55 }
  0x27   : > { %v595_v59 = vadd.s32 4294967169, %v360_v56  ;;  %v262_v60 = vadd.s32 1, %v591_v58  ;;  %v364_v62 = vor.u32 8388608, %v363_v57  ;;  %v733_v4 = vshll.u32 %v260_v61, 8 }
  0x29   : > { %v366_v63 = vadd.s32 1, %v595_v59  ;;  %vm263_vm6 = vcmp.gt.s32.totalorder %v262_v60, 0  ;;  %v735_v6 = vshll.u32 %v364_v62, 8 }
  0x2a   : > { %v264_v0 = vsel %vm263_vm6, %v262_v60, 0  ;;  %vm358_vm6 = vcmp.lt.s32.totalorder %v723_v49, 0 }
  0x2b   : > { %vm367_vm7 = vcmp.gt.s32.totalorder %v366_v63, 0  ;;  %v265_v1 = vshrl.u32 %v264_v0, 5  ;;  %v266_v2 = vand.u32 31, %v264_v0 }
  0x2c   : > { %v368_v3 = vsel %vm367_vm7, %v366_v63, 0  ;;  %vm790_vm7 = vcmp.le.f32.partialorder %v356_v52, 0.7853982 }
  0x2d   : > { %v370_v5 = vand.u32 31, %v368_v3  ;;  %v267_v7 = vsub.s32 32, %v266_v2  ;;  %v269_v9 = vshll.u32 %v677_v8, %v266_v2  ;;  %v272_v11 = vshll.u32 %v678_v10, %v266_v2 }
  0x2e   : > { %v275_v13 = vshll.u32 %v679_v12, %v266_v2  ;;  %v278_v15 = vshll.u32 %v680_v14, %v266_v2  ;;  %v281_v17 = vshll.u32 %v681_v16, %v266_v2  ;;  %vm284_vm8 = vcmp.lt.s32.totalorder %v265_v1, 1 }
  0x2f   : > { %v737_v18 = vshrl.u32 %v368_v3, 5  ;;  %v268_v19 = vshrl.u32 %v677_v8, %v267_v7  ;;  %v270_v20 = vshrl.u32 %v678_v10, %v267_v7  ;;  %v273_v21 = vshrl.u32 %v679_v12, %v267_v7 }
  0x30   : > { %v276_v22 = vshrl.u32 %v680_v14, %v267_v7  ;;  %v279_v23 = vshrl.u32 %v681_v16, %v267_v7  ;;  %v282_v25 = vshrl.u32 %v682_v24, %v267_v7  ;;  %vm285_vm9 = vcmp.lt.s32.totalorder %v265_v1, 2 }
  0x31   : > { %vm287_vm10 = vcmp.lt.s32.totalorder %v265_v1, 4  ;;  %v271_v26 = vor.u32 %v270_v20, %v269_v9  ;;  %v274_v27 = vor.u32 %v273_v21, %v272_v11  ;;  %v371_v29 = vsub.s32 32, %v370_v5 }
  0x32   : > { %v277_v28 = vor.u32 %v276_v22, %v275_v13  ;;  %v280_v30 = vor.u32 %v279_v23, %v278_v15  ;;  %v283_v31 = vor.u32 %v282_v25, %v281_v17  ;;  %vm286_vm11 = vcmp.lt.s32.totalorder %v265_v1, 3 }
  0x33   : > { %v373_v32 = vshll.u32 %v677_v8, %v370_v5  ;;  %v288_v33 = vsel %vm284_vm8, %v268_v19, %v271_v26  ;;  %v292_v35 = vsel %vm284_vm8, %v271_v26, %v274_v27  ;;  %v376_v40 = vshll.u32 %v678_v10, %v370_v5 }
  0x34   : > { %v289_v34 = vsel %vm287_vm10, %v277_v28, 2102212464  ;;  %v296_v36 = vsel %vm284_vm8, %v274_v27, %v277_v28  ;;  %v293_v38 = vsel %vm287_vm10, %v280_v30, 920167782  ;;  %v297_v39 = vsel %vm287_vm10, %v283_v31, 1326507024 }
  0x35   : > { %v290_v37 = vsel %vm286_vm11, %v274_v27, %v289_v34  ;;  %v294_v41 = vsel %vm286_vm11, %v277_v28, %v293_v38  ;;  %v298_v42 = vsel %vm286_vm11, %v280_v30, %v297_v39  ;;  %v372_v43 = vshrl.u32 %v677_v8, %v371_v29 }
  0x36   : > { %v374_v44 = vshrl.u32 %v678_v10, %v371_v29  ;;  %v291_v45 = vsel %vm285_vm9, %v288_v33, %v290_v37  ;;  %v295_v46 = vsel %vm285_vm9, %v292_v35, %v294_v41  ;;  %v299_v47 = vsel %vm285_vm9, %v296_v36, %v298_v42 }
  0x37   : > { %v377_v51 = vshrl.u32 %v679_v12, %v371_v29  ;;  %v746_v53 = vmul.u32.u64.low %v733_v4, %v299_v47  ;;  %v747_v54 = vmul.u32.u64.high %v733_v4, %v299_v47, %v746_v53  ;;  %v379_v59 = vshll.u32 %v679_v12, %v370_v5 }
  0x38   : > { %v750_v55 = vmul.u32.u64.low %v733_v4, %v295_v46  ;;  %v751_v56 = vmul.u32.u64.high %v733_v4, %v295_v46, %v750_v55  ;;  %v375_v57 = vor.u32 %v374_v44, %v373_v32  ;;  %v380_v60 = vshrl.u32 %v680_v14, %v371_v29 }
  0x39   : > { %v378_v58 = vor.u32 %v377_v51, %v376_v40  ;;  %v382_v61 = vshll.u32 %v680_v14, %v370_v5  ;;  %v383_v62 = vshrl.u32 %v681_v16, %v371_v29  ;;  %v385_v63 = vshll.u32 %v681_v16, %v370_v5 }
  0x3a   : > { %v386_v0 = vshrl.u32 %v682_v24, %v371_v29  ;;  %v307_v1 = vmul.u32 %v733_v4, %v291_v45  ;;  %v381_v2 = vor.u32 %v380_v60, %v379_v59  ;;  %vm388_vm12 = vcmp.lt.s32.totalorder %v737_v18, 1 }
  0x3b   : > { %vm389_vm13 = vcmp.lt.s32.totalorder %v737_v18, 2  ;;  %vm309_vm14 = vc.u32 %v747_v54, %v750_v55  ;;  %v310_v3 = vadd.s32 1, %v751_v56  ;;  %v384_v7 = vor.u32 %v383_v62, %v382_v61 }
  0x3c   : > { %vm390_vm15 = vcmp.lt.s32.totalorder %v737_v18, 3  ;;  %v387_v8 = vor.u32 %v386_v0, %v385_v63  ;;  %vm391_vm0 = vcmp.lt.s32.totalorder %v737_v18, 4  ;;  %v392_v9 = vsel %vm388_vm12, %v372_v43, %v375_v57 }
  0x3d   : > { %v396_v5 = vsel %vm388_vm12, %v375_v57, %v378_v58  ;;  %v311_v10 = vsel %vm309_vm14, %v310_v3, %v751_v56  ;;  %v393_v4 = vsel %vm391_vm0, %v381_v2, 2102212464  ;;  %v397_v11 = vsel %vm391_vm0, %v384_v7, 920167782 }
  0x3e   : > { %v400_v12 = vsel %vm388_vm12, %v378_v58, %v381_v2  ;;  %v312_v13 = vadd.s32 %v311_v10, %v307_v1  ;;  %v394_v14 = vsel %vm390_vm15, %v378_v58, %v393_v4  ;;  %v398_v15 = vsel %vm390_vm15, %v381_v2, %v397_v11 }
  0x3f   : > { %v401_v16 = vsel %vm391_vm0, %v387_v8, 1326507024  ;;  %v395_v17 = vsel %vm389_vm13, %v392_v9, %v394_v14  ;;  %v399_v19 = vsel %vm389_vm13, %v396_v5, %v398_v15  ;;  %v308_v41 = vadd.s32 %v750_v55, %v747_v54 }
  0x40   : > { %v402_v20 = vsel %vm390_vm15, %v384_v7, %v401_v16  ;;  %v313_v21 = vadd.s32 536870912, %v312_v13  ;;  %v768_v23 = vmul.u32.u64.low %v735_v6, %v399_v19  ;;  %v769_v24 = vmul.u32.u64.high %v735_v6, %v399_v19, %v768_v23 }
  0x41   : > { %v403_v22 = vsel %vm389_vm13, %v400_v12, %v402_v20  ;;  %v411_v28 = vmul.u32 %v735_v6, %v395_v17  ;;  %vm344_vm11 = vweird.f32 %v721_v48  ;;  %vm448_vm15 = vweird.f32 %v723_v49 }
  0x42   : > { %v772_v25 = vmul.u32.u64.low %v735_v6, %v403_v22  ;;  %v773_v26 = vmul.u32.u64.high %v735_v6, %v403_v22, %v772_v25  ;;  %v314_v27 = vshrl.u32 %v313_v21, 30  ;;  %v414_v30 = vadd.s32 1, %v769_v24 }
  0x44   : > { %v315_v29 = vshll.u32 %v314_v27, 30  ;;  %vm413_vm1 = vc.u32 %v773_v26, %v768_v23  ;;  %v412_v61 = vadd.s32 %v768_v23, %v773_v26  ;;  %v338_v54 = vsub.s32 4, %v314_v27 }
  0x45   : > { %v415_v18 = vsel %vm413_vm1, %v414_v30, %v769_v24 }
  0x46   : > { %v316_v31 = vsub.s32 %v312_v13, %v315_v29  ;;  %v416_v32 = vadd.s32 %v415_v18, %v411_v28  ;;  %v339_v9 = vsel %vm254_vm4, %v338_v54, %v314_v27  ;;  %v460_v18 = vld [vmem:[%s171_s13] sm:$0xff] }
  0x47   : > { %v341_v12 = vsel %vm253_vm5, 0, %v339_v9 }
  0x48   : > { %v318_v33 = vsub.s32 0, %v316_v31  ;;  %v417_v34 = vadd.s32 536870912, %v416_v32  ;;  %v345_v17 = vadd.s32 3, %v341_v12 }
  0x4a   : > { %v592_v35 = vmin.u32 %v318_v33, %v316_v31  ;;  %v418_v36 = vshrl.u32 %v417_v34, 30  ;;  %v346_v22 = vand.u32 3, %v345_v17 }
  0x4c   : > { %v320_v37 = vclz %v592_v35  ;;  %v419_v38 = vshll.u32 %v418_v36, 30  ;;  %v442_v16 = vsub.s32 4, %v418_v36  ;;  %vm351_vm8 = vcmp.eq.s32.totalorder %v346_v22, 2 }
  0x4d   : > { %vm348_vm9 = vcmp.eq.s32.totalorder %v346_v22, 0  ;;  %vm347_vm10 = vcmp.lt.s32.totalorder %v346_v22, 2 }
  0x4e   : > { %v593_v39 = vadd.s32 4294967294, %v320_v37  ;;  %v420_v40 = vsub.s32 %v416_v32, %v419_v38  ;;  %v443_v21 = vsel %vm358_vm6, %v442_v16, %v418_v36 }
  0x4f   : > { %v445_v25 = vsel %vm790_vm7, 0, %v443_v21 }
  0x50   : > { %vm594_vm2 = vcmp.lt.s32.totalorder %v593_v39, 0  ;;  %v422_v42 = vsub.s32 0, %v420_v40  ;;  %v449_v28 = vadd.s32 3, %v445_v25 }
  0x51   : > { %v323_v6 = vsel %vm594_vm2, 0, %v593_v39 }
  0x52   : > { %v324_v43 = vsub.s32 32, %v323_v6  ;;  %v325_v44 = vshll.u32 %v316_v31, %v323_v6  ;;  %v328_v45 = vsub.s32 4294967266, %v323_v6  ;;  %v596_v46 = vmin.u32 %v422_v42, %v420_v40 }
  0x53   : > { %v450_v33 = vand.u32 3, %v449_v28 }
  0x54   : > { %v326_v47 = vshrl.u32 %v308_v41, %v324_v43  ;;  %v329_v51 = vadd.s32 127, %v328_v45  ;;  %v424_v53 = vclz %v596_v46  ;;  %v461_v41 = vld [vmem:[%s171_s13 + $0x8] sm:$0xff] }
  0x55   : > { %vm455_vm12 = vcmp.eq.s32.totalorder %v450_v33, 2  ;;  %vm452_vm13 = vcmp.eq.s32.totalorder %v450_v33, 0  ;;  %vm451_vm14 = vcmp.lt.s32.totalorder %v450_v33, 2 }
  0x56   : > { %v327_v56 = vor.u32 %v326_v47, %v325_v44  ;;  %v330_v57 = vshll.u32 %v329_v51, 23  ;;  %v597_v58 = vadd.s32 4294967294, %v424_v53 }
  0x58   : > { %v331_v59 = vor.u32 4788187, %v330_v57  ;;  %v334_v60 = vcvt.s32.f32 %v327_v56  ;;  %vm598_vm3 = vcmp.lt.s32.totalorder %v597_v58, 0 }
  0x59   : > { %v427_v55 = vsel %vm598_vm3, 0, %v597_v58 }
  0x5a   : > { %v332_v62 = vand.u32 2147483647, %v331_v59  ;;  %v428_v63 = vsub.s32 32, %v427_v55  ;;  %v429_v0 = vshll.u32 %v420_v40, %v427_v55  ;;  %v432_v1 = vsub.s32 4294967266, %v427_v55 }
  0x5c   : > { %v335_v2 = vmul.f32 %v334_v60, %v332_v62  ;;  %v430_v3 = vshrl.u32 %v412_v61, %v428_v63  ;;  %v433_v7 = vadd.s32 127, %v432_v1 }
  0x5e   : > { %v336_v8 = vxor.u32 2147483648, %v335_v2  ;;  %v431_v5 = vor.u32 %v430_v3, %v429_v0  ;;  %v434_v10 = vshll.u32 %v433_v7, 23 }
  0x60   : > { %v337_v4 = vsel %vm254_vm4, %v336_v8, %v335_v2  ;;  %v435_v13 = vor.u32 4788187, %v434_v10  ;;  %v438_v14 = vcvt.s32.f32 %v431_v5 }
  0x61   : > { %v340_v11 = vsel %vm253_vm5, %v721_v48, %v337_v4 }
  0x62   : > { %644 = vcosq.f32 %v340_v11  ;;  %v436_v15 = vand.u32 2147483647, %v435_v13 }
  0x63   : > { %646 = vsinq.f32 %v340_v11 }
  0x64   : > { %v439_v19 = vmul.f32 %v438_v14, %v436_v15 }
  0x66   : > { %v440_v20 = vxor.u32 2147483648, %v439_v19 }
  0x68   : > { %v441_v23 = vsel %vm358_vm6, %v440_v20, %v439_v19 }
  0x69   : > { %v444_v24 = vsel %vm790_vm7, %v723_v49, %v441_v23 }
  0x6a   : > { %648 = vcosq.f32 %v444_v24 }
  0x6b   : > { %650 = vsinq.f32 %v444_v24 }
  0x6c   : > { %v645_v26 = vpop.eup %644 }
  0x6d   : > { %v647_v52 = vpop.eup %646  ;;  %v352_v27 = vxor.u32 2147483648, %v645_v26 }
  0x6e   : > { %v349_v29 = vxor.u32 2147483648, %v647_v52 }
  0x6f   : > { %v353_v30 = vsel %vm351_vm8, %v352_v27, %v647_v52 }
  0x70   : > { %v350_v31 = vsel %vm348_vm9, %v645_v26, %v349_v29 }
  0x71   : > { %v354_v32 = vsel %vm347_vm10, %v350_v31, %v353_v30 }
  0x72   : > { %v355_v34 = vsel %vm344_vm11, nan, %v354_v32 }
  0x73   : > { %v462_v35 = vadd.f32 %v460_v18, %v355_v34 }
  0x74   : > { %v649_v36 = vpop.eup %648 }
  0x75   : > { %464 = vst [vmem:[%s185_s16] sm:$0xff] %v462_v35  ;;  %v651_v37 = vpop.eup %650  ;;  %v456_v38 = vxor.u32 2147483648, %v649_v36 }
  0x76   : > { %v453_v39 = vxor.u32 2147483648, %v651_v37 }
  0x77   : > { %v457_v48 = vsel %vm455_vm12, %v456_v38, %v651_v37 }
  0x78   : > { %v454_v40 = vsel %vm452_vm13, %v649_v36, %v453_v39 }
  0x79   : > { %v458_v6 = vsel %vm451_vm14, %v454_v40, %v457_v48 }
  0x7a   : > { %v459_v42 = vsel %vm448_vm15, nan, %v458_v6 }
  0x7b   : > { %v463_v43 = vadd.f32 %v461_v41, %v459_v42 }
  0x7d   : > { %465 = vst [vmem:[%s185_s16 + $0x8] sm:$0xff] %v463_v43 }
  0x7e PF: > { %s11_s8 = sadd.s32 1, %s674_s8   ;;  %s822_s6 = smov %s670_s7 }
  0x7f   : > { %p8_p5 = scmp.ge.s32.totalorder %s11_s8, 4   ;;  %s823_s7 = smov %s825_s9 }
  0x81   :  { %10 = sbr.rel (!%p8_p5) target bundleno = 2 (0x2), region = 54 }

// kernel: position_encoding_sine_table.1
= control target key start
LH: loop header
LB: loop body
LE: loop exit
PB: predicated region body
PF: predicated region fallthrough
CT: control target
= control target key end

     0   :  { %s468_s9 = smov 0   ;;  %s470_s10 = smov 0   ;;  %s495_s0 = inlined_call_operand.vmem [shape: f32[2,8,256], index: 0, kind: input, shape index: {}]   ;;  %s496_s1 = inlined_call_operand.vmem [shape: f32[8,256], index: 1, kind: input, shape index: {}]   ;;  %s497_s2 = inlined_call_operand.vmem [shape: f32[2,8,256], index: 2, kind: output, shape index: {}]  }
   0x1   :  { %s472_s11 = smov 0  }
   0x2 LB: > { %s24_s12 = sadd.s32 1, %s447_s10  ;;  %p396_p0 = scmp.ge.s32.totalorder %s451_s11, 1  ;;  %s451_s11 = sphi %s472_s11, %s12_s11   ;;  %s447_s10 = sphi %s470_s10, %s499_s10   ;;  %s443_s9 = sphi %s468_s9, %s498_s9  }
   0x3   : > { %p25_p1 = scmp.ge.s32.totalorder %s24_s12, 2  ;;  %p165_p2 = scmp.lt.s32.totalorder %s451_s11, 3 }
   0x5   : > { %s501_s12 = smov (%p25_p1, %s24_s12), 0  ;;  %p166_p3 = pnand %p396_p0, %p165_p2 }
   0x6   : > { %p213_p4 = scmp.lt.s32.totalorder (!%p166_p3), %s443_s9, 1  ;;  %v252_v0 = vld [vmem:[%s496_s1] sm:$0xff] (!%p166_p3)  ;;  %v253_v1 = vld [vmem:[%s496_s1 + $0x8] sm:$0xff] (!%p166_p3) }
   0x7   : > { %169 = sbr.rel (%p166_p3) target bundleno = 21 (0x15), region = 28 }
   0xe   : > { %s503_s9 = smov (!%p213_p4, %s443_s9), 1 }
   0xf   : > { %s403_s13 = sshll.u32 %s503_s9, 4 }
  0x10   : > { %s224_s20 = scalar_lea.vmem %s495_s0, %s403_s13  ;;  %s248_s23 = scalar_lea.vmem %s497_s2, %s403_s13 }
  0x11   : > { %v250_v2 = vld [vmem:[%s224_s20] sm:$0xff]  ;;  %v251_v3 = vld [vmem:[%s224_s20 + $0x8] sm:$0xff] }
  0x12   : > { %v254_v4 = vadd.f32 %v252_v0, %v250_v2  ;;  %v255_v5 = vadd.f32 %v253_v1, %v251_v3 }
  0x14   : > { %256 = vst [vmem:[%s248_s23] sm:$0xff] %v254_v4  ;;  %257 = vst [vmem:[%s248_s23 + $0x8] sm:$0xff] %v255_v5 }
  0x15 PF: > { %s12_s11 = sadd.s32 1, %s451_s11   ;;  %s498_s9 = smov %s447_s10 }
  0x16   : > { %p9_p5 = scmp.ge.s32.totalorder %s12_s11, 4   ;;  %s499_s10 = smov %s501_s12 }
  0x18   :  { %11 = sbr.rel (!%p9_p5) target bundleno = 2 (0x2), region = 61 }

</bundles_post_ra>
